<compile_context>
chip_gen: v7x
topology: tpu7x:2x2x1
jax: 0.10.0
libtpu: 0.0.40
codegen_flags: <defaults>
</compile_context>

<pallas_src>
import jax
import jax.numpy as jnp
from jax import lax
from jax.experimental import pallas as pl
from jax.experimental.pallas import tpu as pltpu


def _sca_kernel(x_ref, w_ref, b_ref, o_ref):
    # x_ref : (NB, C, HW)  batch of samples (channels on sublanes, spatial on lanes)
    # w_ref : (C, C)       1x1-conv weight, w[out_c, in_c]
    # b_ref : (1, C)       bias (lane-major)
    # o_ref : (NB, C, HW)
    x = x_ref[...]  # stay in input dtype; no full-tile upcast

    # AdaptiveAvgPool2d(1): global spatial mean, accumulated in float32.
    pooled = jnp.mean(x, axis=-1, dtype=jnp.float32)            # (NB, C)

    # Conv2d(C, C, 1) on a 1x1 map == per-sample channel mix:
    #   attn[n, c] = sum_k w[c, k] * pooled[n, k] + b[c]
    # dot_general contracts pooled's channel axis with w's input-channel axis
    # on the MXU (no explicit transpose / broadcast-multiply on the VPU).
    w = w_ref[...].astype(jnp.float32)
    attn = lax.dot_general(pooled, w, (((1,), (1,)), ((), ())),
                           preferred_element_type=jnp.float32)  # (NB, C)
    attn = attn + b_ref[...].astype(jnp.float32)                # (NB, C)

    # x * ca(x): broadcast attention over all spatial positions; the big
    # elementwise multiply runs in the input dtype.
    o_ref[...] = x * attn.astype(x.dtype)[:, :, None]


def _pick_batch_block(N, per_sample_bytes, budget_bytes):
    """Largest NB dividing N whose block fits the budget, keeping >=2 grid steps."""
    nb = max(1, min(N, budget_bytes // max(per_sample_bytes, 1)))
    if N >= 2:
        # keep at least two grid steps so v7x's two TensorCores both get work
        nb = max(1, min(nb, N // 2))
    while N % nb != 0:
        nb -= 1
    return nb


def simple_channel_attention(x, weight, bias, *, block_budget_bytes=5 << 20):
    """Forward of SimpleChannelAttention.

    x: (N, C, H, W); weight: (C, C) = squeezed Conv2d(C, C, 1) weight; bias: (C,).
    """
    N, C, H, W = x.shape
    HW = H * W
    x_flat = x.reshape(N, C, HW)
    b2d = bias.reshape(1, C)

    itemsize = jnp.dtype(x.dtype).itemsize
    nb = _pick_batch_block(N, C * HW * itemsize, block_budget_bytes)
    grid = (N // nb,)
    # NOTE: if a single sample tile (C*HW*itemsize) ever exceeds the budget
    # (very large feature maps), an HW-tiled two-pass scheme (accumulate the
    # spatial sum into a (C,1) scratch across HW tiles, then a second pass
    # for the multiply) would keep blocks within v7x's 64 MiB VMEM.

    # in/out blocks are double-buffered -> ~4x block bytes resident, + weight/bias.
    block_bytes = nb * C * HW * itemsize
    vmem_limit = int(min(56 << 20,
                         max(32 << 20, 4 * block_bytes + 4 * (C * C + C) * 4 + (4 << 20))))

    out_flat = pl.pallas_call(
        _sca_kernel,
        out_shape=jax.ShapeDtypeStruct((N, C, HW), x.dtype),
        grid_spec=pltpu.PrefetchScalarGridSpec(
            num_scalar_prefetch=0,
            grid=grid,
            in_specs=[
                pl.BlockSpec((nb, C, HW), lambda n: (n, 0, 0)),
                pl.BlockSpec((C, C), lambda n: (0, 0)),
                pl.BlockSpec((1, C), lambda n: (0, 0)),
            ],
            out_specs=pl.BlockSpec((nb, C, HW), lambda n: (n, 0, 0)),
        ),
        compiler_params=pltpu.CompilerParams(
            dimension_semantics=("parallel",),
            vmem_limit_bytes=vmem_limit,
        ),
    )(x_flat, weight, b2d)

    return out_flat.reshape(N, C, H, W)


def _reference(x, weight, bias):
    # Pure-JAX reference of the PyTorch forward.
    pooled = jnp.mean(x, axis=(2, 3))                      # (N, C)
    attn = pooled @ weight.T + bias                        # (N, C)
    return x * attn[:, :, None, None]


if __name__ == "__main__":
    key = jax.random.PRNGKey(0)
    kx, kw, kb = jax.random.split(key, 3)

    N, C, H, W = 2, 4, 16, 16
    x = jax.random.normal(kx, (N, C, H, W), dtype=jnp.float32)
    # Deterministic synthetic parameters (Conv2d(C, C, 1) weight & bias).
    weight = jax.random.normal(kw, (C, C), dtype=jnp.float32) * 0.1
    bias = jax.random.normal(kb, (C,), dtype=jnp.float32) * 0.1

    out = simple_channel_attention(x, weight, bias)
    out = jax.block_until_ready(out)

    ref = _reference(x, weight, bias)
    assert out.shape == (N, C, H, W)
    assert jnp.allclose(out, ref, atol=1e-5, rtol=1e-5), "mismatch vs reference"

    print("KERNEL_OK")
</pallas_src>

<mosaic_0001>
module attributes {stable_mosaic.version = 11 : i64} {
  func.func @_sca_kernel(%arg0: i32, %arg1: memref<1x4x256xf32, #tpu.memory_space<vmem>>, %arg2: memref<4x4xf32, #tpu.memory_space<vmem>>, %arg3: memref<1x4xf32, #tpu.memory_space<vmem>>, %arg4: memref<1x4x256xf32, #tpu.memory_space<vmem>>) attributes {dimension_semantics = [#tpu.dimension_semantics<parallel>], iteration_bounds = array<i64: 2>, scalar_prefetch = 0 : i64, scratch_operands = 0 : i64, tpu.core_type = #tpu.core_type<tc>, window_params = [{transform_indices = @transform_0, window_bounds = array<i64: 1, 4, 256>}, {pipeline_mode = #tpu.pipeline_mode<synchronous>, transform_indices = @transform_1, window_bounds = array<i64: 4, 4>}, {pipeline_mode = #tpu.pipeline_mode<synchronous>, transform_indices = @transform_2, window_bounds = array<i64: 1, 4>}, {transform_indices = @transform_3, window_bounds = array<i64: 1, 4, 256>}]} {
    %c0 = arith.constant 0 : index
    %c0_0 = arith.constant 0 : index
    %c0_1 = arith.constant 0 : index
    %0 = vector.load %arg1[%c0, %c0_0, %c0_1] : memref<1x4x256xf32, #tpu.memory_space<vmem>>, vector<1x4x256xf32>
    %cst = arith.constant dense<0.000000e+00> : vector<1x4xf32>
    %1 = vector.multi_reduction <add>, %0, %cst [2] : vector<1x4x256xf32> to vector<1x4xf32>
    %cst_2 = arith.constant 2.560000e+02 : f32
    %2 = vector.broadcast %cst_2 : f32 to vector<1x4xf32>
    %3 = arith.divf %1, %2 : vector<1x4xf32>
    %c0_3 = arith.constant 0 : index
    %c0_4 = arith.constant 0 : index
    %4 = vector.load %arg2[%c0_3, %c0_4] : memref<4x4xf32, #tpu.memory_space<vmem>>, vector<4x4xf32>
    %cst_5 = arith.constant dense<0.000000e+00> : vector<1x4xf32>
    %5 = tpu.matmul %3, %4, %cst_5 {dimension_numbers = #tpu.dot_dimension_numbers<[1], [1], [0], [0], [0, 0, 1, 0], [], []>} : vector<1x4xf32>, vector<4x4xf32>, vector<1x4xf32> -> vector<1x4xf32>
    %c0_6 = arith.constant 0 : index
    %c0_7 = arith.constant 0 : index
    %6 = vector.load %arg3[%c0_6, %c0_7] : memref<1x4xf32, #tpu.memory_space<vmem>>, vector<1x4xf32>
    %7 = arith.addf %5, %6 : vector<1x4xf32>
    %8 = vector.shape_cast %7 : vector<1x4xf32> to vector<1x4x1xf32>
    %9 = vector.broadcast %8 : vector<1x4x1xf32> to vector<1x4x256xf32>
    %10 = arith.mulf %0, %9 : vector<1x4x256xf32>
    %c0_8 = arith.constant 0 : index
    %c0_9 = arith.constant 0 : index
    %c0_10 = arith.constant 0 : index
    %11 = vector.load %arg4[%c0_8, %c0_9, %c0_10] : memref<1x4x256xf32, #tpu.memory_space<vmem>>, vector<1x4x256xf32>
    tpu.vector_store %arg4[%c0_8, %c0_9, %c0_10], %10 {strides = array<i32>} : memref<1x4x256xf32, #tpu.memory_space<vmem>>, vector<1x4x256xf32>,
    return
  }
  func.func @transform_0(%arg0: i32) -> (i32, i32, i32) {
    %c0_i32 = arith.constant 0 : i32
    %c0_i32_0 = arith.constant 0 : i32
    %c0_i32_1 = arith.constant 0 : i32
    return %arg0, %c0_i32, %c0_i32_0 : i32, i32, i32
  }
  func.func @transform_1(%arg0: i32) -> (i32, i32) {
    %c0_i32 = arith.constant 0 : i32
    %c0_i32_0 = arith.constant 0 : i32
    %c0_i32_1 = arith.constant 0 : i32
    return %c0_i32, %c0_i32_0 : i32, i32
  }
  func.func @transform_2(%arg0: i32) -> (i32, i32) {
    %c0_i32 = arith.constant 0 : i32
    %c0_i32_0 = arith.constant 0 : i32
    %c0_i32_1 = arith.constant 0 : i32
    return %c0_i32, %c0_i32_0 : i32, i32
  }
  func.func @transform_3(%arg0: i32) -> (i32, i32, i32) {
    %c0_i32 = arith.constant 0 : i32
    %c0_i32_0 = arith.constant 0 : i32
    %c0_i32_1 = arith.constant 0 : i32
    return %arg0, %c0_i32, %c0_i32_0 : i32, i32, i32
  }
}

</mosaic_0001>

<bundles_post_ra>
// kernel: tpu_custom_call.1
= control target key start
LH: loop header
LB: loop body
LE: loop exit
PB: predicated region body
PF: predicated region fallthrough
CT: control target
= control target key end

     0   :  { %8 = vsyncpa [#allocation3], 0  ;;  %s862_s0 = inlined_call_operand.hbm [shape: f32[2,4,256], index: 0, kind: input, shape index: {}]   ;;  %s863_s1 = inlined_call_operand.hbm [shape: f32[4,4], index: 1, kind: input, shape index: {}]   ;;  %s864_s2 = inlined_call_operand.vmem [shape: f32[1,4], index: 2, kind: input, shape index: {}]   ;;  %s865_s3 = inlined_call_operand.hbm [shape: f32[2,4,256], index: 3, kind: output, shape index: {}]  }
   0x1   :  { %10 = vsyncpa [#allocation3 + $0x1], 0 }
   0x2   :  { %11 = vsyncpa [#allocation6], 0 }
   0x3   :  { %12 = vsyncpa [#allocation4], 0 }
   0x4   :  { %14 = vsyncpa [#allocation4 + $0x1], 0  ;;  %s654_s12 = smov 0   ;;  %s656_s13 = smov 0  }
   0x5   :  { %s658_s14 = smov 0   ;;  %s660_s15 = smov 0  }
   0x6 LB: > { %s675_s16 = sadd.s32 4294967295, %s626_s15   ;;  %s410_s17 = sadd.s32 4294967294, %s626_s15   ;;  %s626_s15 = sphi %s660_s15, %s889_s15   ;;  %s622_s14 = sphi %s658_s14, %s888_s14   ;;  %s618_s13 = sphi %s656_s13, %s887_s13   ;;  %s614_s12 = sphi %s654_s12, %s886_s12  }
   0x7   : > { %p40_p0 = scmp.ne.s32.totalorder %s618_s13, %s614_s12  ;;  %p866_p1 = scmp.eq.s32.totalorder %s675_s16, 0 }
   0x8   : > { %p112_p3 = scmp.eq.s32.totalorder %s410_s17, 1  ;;  %p411_p5 = scmp.ge.s32.totalorder %s626_s15, 1 }
   0x9   : > { %p684_p4 = por %p866_p1, %p40_p0  ;;  %p119_p7 = scmp.lt.s32.totalorder %s626_s15, 3 }
   0xa   : > { %p689_p6 = por %p112_p3, %p40_p0  ;;  %s628_s21 = smov [#allocation5]  }
   0xb   : > { %s869_s18 = scalar_select %p684_p4, 1, 0 }
   0xc   : > { %s870_s19 = scalar_select %p689_p6, 1, 0 }
   0xd   : > { %p694_p8 = pnand %p411_p5, %p119_p7  ;;  %s132_s22 = sshll.u32 %s628_s21, 4  ;;  %s133_s22 = int_to_ptr.vmem [resolvable:$true] %s132_s22 }
   0xe   : > { %s702_s23 = sadd.s32 1, %s626_s15   ;;  %s27_s27 = sadd.s32 1, %s622_s14 }
   0xf   : > { %s871_s20 = scalar_select %p694_p8, 1, 0 }
  0x10   : > { %p445_p10 = pneg %p694_p8  ;;  %s24_s25 = ssub.s32 %s626_s15, %s702_s23 }
  0x11   : > { %p712_p12 = scmp.eq.s32.totalorder %s24_s25, 0  ;;  %s498_s30 = scalar_lea.hbm %s863_s1, 64 }
  0x12   : > { %p706_p11 = pnand %p445_p10, %p866_p1  ;;  %p499_p0 = scmp.ne.s32.totalorder %s863_s1, %s498_s30 }
  0x13   : > { %s873_s26 = scalar_select %p712_p12, 1, 0 }
  0x14   : > { %p500_p3 = pneg %p706_p11  ;;  %p505_p10 = scmp.lt.u32.totalorder %s498_s30, %s863_s1 }
  0x16   : > { %p501_p5 = pnand %p500_p3, %p499_p0 }
  0x18   : > { %p502_p7 = pneg %p501_p5 }
  0x1a   : > { %p507_p9 = pnand %p505_p10, %p502_p7 }
  0x1c   : > { %510 = shalt.err (!%p507_p9)
}
  0x1d   : > { %s511_s8 = scalar_lea.vmem %s133_s22, 64  ;;  %p519_p6 = scmp.lt.s32.totalorder %s133_s22, %s133_s22 }
  0x1e   : > { %p512_p1 = scmp.ne.s32.totalorder %s133_s22, %s511_s8  ;;  %p520_p4 = scmp.lt.s32.totalorder %s511_s8, %s511_s8 }
  0x20   : > { %p514_p2 = pnand %p512_p1, %p500_p3  ;;  %p521_p8 = por %p520_p4, %p519_p6 }
  0x22   : > { %p515_p13 = pneg %p514_p2 }
  0x24   : > { %p522_p12 = pnand %p521_p8, %p515_p13 }
  0x26   : > { %525 = shalt.err (!%p522_p12)
}
  0x27   : > { %448 = dma.hbm_to_vmem [thread:$0]  (!%p706_p11), %s863_s1, 64, %s133_s22, [#allocation6]  }
  0x28   : > { %p874_p1 = scmp.ne.s32.totalorder %s873_s26, 0  ;;  %p35_p2 = scmp.eq.s32.totalorder %s626_s15, 0 }
  0x29   : > { %p875_p4 = scmp.ne.s32.totalorder %s622_s14, %s618_s13  ;;  %p876_p6 = scmp.eq.s32.totalorder %s675_s16, 1 }
  0x2a   : > { %s738_s11 = scalar_select %p874_p1, %s622_s14, %s27_s27  }
  0x2b   : > { %p746_p8 = por %p876_p6, %p875_p4  ;;  %p458_p9 = scmp.lt.s32.totalorder %s626_s15, 2 }
  0x2c   : > { %s146_s21 = sand.u32 1, %s622_s14   ;;  %p878_p12 = pmov %p875_p4 }
  0x2d   : > { %s414_s24 = sshll.u32 %s146_s21, 3  ;;  %s428_s25 = sshll.u32 %s626_s15, 7 }
  0x2e   : > { %p36_p13 = por %p35_p2, %p878_p12  ;;  %s759_s22 = scalar_lea.hbm %s862_s0, %s428_s25 }
  0x2f   : > { %s150_s26 = scalar_lea.vmem [#allocation2], %s414_s24  ;;  %s147_s4 = scalar_lea.sflag [#allocation3], %s146_s21 }
  0x30   : > { %s158_s27 = sshll.u32 %s150_s26, 4  ;;  %p761_p11 = pnand %p458_p9, %p36_p13  ;;  %s765_s27 = int_to_ptr.vmem [resolvable:$true] %s158_s27 }
  0x31   : > { %s526_s5 = scalar_lea.hbm %s759_s22, 128  ;;  %s531_s8 = scalar_lea.hbm %s862_s0, 256 }
  0x32   : > { %p527_p0 = scmp.ne.s32.totalorder %s759_s22, %s526_s5  ;;  %p528_p3 = pneg %p761_p11 }
  0x33   : > { %p532_p10 = scmp.lt.u32.totalorder %s759_s22, %s862_s0  ;;  %p533_p1 = scmp.lt.u32.totalorder %s531_s8, %s526_s5 }
  0x34   : > { %p529_p5 = pnand %p528_p3, %p527_p0  ;;  %p535_p4 = scmp.lt.u32.totalorder %s526_s5, %s759_s22 }
  0x35   : > { %p534_p2 = por %p533_p1, %p532_p10 }
  0x36   : > { %p530_p7 = pneg %p529_p5 }
  0x37   : > { %p536_p6 = por %p535_p4, %p534_p2 }
  0x39   : > { %p537_p9 = pnand %p536_p6, %p530_p7 }
  0x3b   : > { %540 = shalt.err (!%p537_p9)
}
  0x3c   : > { %s541_s21 = scalar_lea.vmem %s765_s27, 128  ;;  %s629_s24 = smov [#allocation2]  }
  0x3d   : > { %p542_p12 = scmp.ne.s32.totalorder %s765_s27, %s541_s21  ;;  %s546_s25 = sshll.u32 %s629_s24, 4  ;;  %s547_s25 = int_to_ptr.vmem [resolvable:$false] %s546_s25 }
  0x3e   : > { %s548_s28 = scalar_lea.vmem %s547_s25, 256  ;;  %p549_p5 = scmp.lt.s32.totalorder %s765_s27, %s547_s25 }
  0x3f   : > { %p544_p13 = pnand %p542_p12, %p528_p3  ;;  %p550_p10 = scmp.lt.s32.totalorder %s548_s28, %s541_s21 }
  0x41   : > { %p545_p0 = pneg %p544_p13  ;;  %p551_p1 = por %p550_p10, %p549_p5 }
  0x43   : > { %p552_p2 = pnand %p551_p1, %p545_p0 }
  0x45   : > { %555 = shalt.err (!%p552_p2)
}
  0x46   : > { %452 = dma.hbm_to_vmem [thread:$0]  (!%p761_p11), %s759_s22, 128, %s765_s27, %s147_s4  }
  0x47   : > { %p880_p7 = scmp.ne.s32.totalorder %s871_s20, 0 }
  0x48   : > { %s795_s29 = sand.u32 (!%p880_p7), 1, %s618_s13   ;;  %p881_p3 = scmp.ne.s32.totalorder (!%p880_p7), %s869_s18, 0 }
  0x49   : > { %167 = sbr.rel (%p880_p7) target bundleno = 585 (0x249), region = 32  ;;  %s418_s26 = sshll.u32 (!%p880_p7), %s795_s29, 3 }
  0x4a   : > { %s170_s5 = scalar_lea.sflag (!%p880_p7), [#allocation3], %s795_s29  ;;  %s173_s6 = scalar_lea.vmem (!%p880_p7), [#allocation2], %s418_s26 }
  0x50   : > { %601 = dma.done.wait (%p881_p3), %s170_s5, 128  }
  0x51   : > { %603 = vsyncadd (%p881_p3), %s170_s5, 4294967168  ;;  %p882_p11 = scmp.eq.s32.totalorder %s675_s16, 0 }
  0x53   : > { %605 = dma.done.wait (%p882_p11), [#allocation6], 64   ;;  %p883_p4 = pmov %p882_p11 }
  0x54   : > { %vm204_vm0 = vcmask 1043456   ;;  %v200_v0 = vld [vmem:[%s173_s6] sm:$0xff]  ;;  %v630_v5 = vmov 0.0   ;;  %v212_v6 = vld [vmem:[#allocation5] sm:$0xf]  ;;  %vm221_vm1 = vcmask 31744   ;;  %v215_v7 = vlaneseq }
  0x55   : > { %607 = vsyncadd (%p883_p4), [#allocation6], 4294967232  ;;  %v202_v1 = vcombine.high %v200_v0, %v200_v0  ;;  %v205_v2 = vsel %vm204_vm0, %v200_v0, 0.0  ;;  %432 = vmatprep.subr.mxu0 %v630_v5  ;;  %vm631_vm2 = vmmov 0   ;;  %v213_v14 = vld [vmem:[%s864_s2] sm:$0x1] }
  0x56   : > { %433 = vmatpush3.xpose.msk.msra.mxu0 %vm221_vm1, %v212_v6  ;;  %434 = vmatprep.mubr.msk.f32.mxu0 %vm631_vm2, %v630_v5  ;;  %v216_v8 = vand.u32 127, %v215_v7  ;;  %v218_v9 = vshrl.u32 %v215_v7, 7  ;;  %v632_v20 = vmov 839922192   ;;  %s429_s22 = sshll.u32 %s675_s16, 7  ;;  %s199_s27 = scalar_lea.vmem [#allocation7], %s418_s26 }
  0x57   : > { %v206_v3 = vsel %vm204_vm0, %v202_v1, 0.0  ;;  %v306_v21 = vunpack.c.l.s4 %v632_v20  ;;  %s330_s30 = sshll.u32 %s199_s27, 4  ;;  %s818_s8 = scalar_lea.hbm %s865_s3, %s429_s22  ;;  %s820_s30 = int_to_ptr.vmem [resolvable:$true] %s330_s30 }
  0x58   : > { %v207_v4 = vadd.f32 %v206_v3, %v205_v2  ;;  %v219_v10 = vsub.s32 %v216_v8, %v218_v9  ;;  %v299_v15 = vsub.s32 0, %v218_v9  ;;  %s316_s9 = scalar_lea.sflag [#allocation4], %s795_s29  ;;  %s556_s10 = scalar_lea.vmem %s820_s30, 128 }
  0x59   : > { %v307_v22 = vunpack.c.0.s8 %v306_v21  ;;  %p557_p6 = scmp.ne.s32.totalorder %s820_s30, %s556_s10  ;;  %s633_s16 = smov [#allocation7]  }
  0x5a   : > { %208 = vadd.xlane.f32.xlu0 %v207_v4  ;;  %s560_s21 = sshll.u32 %s633_s16, 4  ;;  %s561_s21 = int_to_ptr.vmem [resolvable:$false] %s560_s21 }
  0x5b   : > { %v310_v23 = vsub.s32 %v307_v22, %v218_v9  ;;  %p558_p9 = pnand %p557_p6, %p746_p8  ;;  %s562_s24 = scalar_lea.vmem %s561_s21, 256 }
  0x5c   : > { %p563_p13 = scmp.lt.s32.totalorder %s820_s30, %s561_s21  ;;  %p564_p0 = scmp.lt.s32.totalorder %s562_s24, %s556_s10 }
  0x5d   : > { %p559_p12 = pneg %p558_p9 }
  0x5e   : > { %p565_p5 = por %p564_p0, %p563_p13 }
  0x60   : > { %p566_p10 = pnand %p565_p5, %p559_p12 }
  0xe7   : > { %v209_v11 = vpop.xlane.xlu0 %208 }
  0xe8   : > { %v211_v12 = vmul.f32 0.00390625, %v209_v11 }
  0xea   : > { %v220_v13 = vrot.slane %v211_v12, %v219_v10 }
  0xec   : > { %435 = vmatmul.mubr.msk.f32.vlgmr.msra.gmra.mrb[0].mxu0 %vm221_vm1, %v220_v13 }
 0x1bf   : > { %v293_v16 = vpop.f32.mrb[0].mxu0 }
 0x1c0   : > { %v294_v17 = vadd.f32 %v293_v16, %v213_v14  ;;  %v436_v18 = vpop.f32.mrb[1].mxu0 }
 0x1c2   : > { %v300_v19 = vrot.slane %v294_v17, %v299_v15 }
 0x1c4   : > { %302 = vbcast.lane.b32.xlu0 %v300_v19, 256 }
 0x236   : > { %v303_v24 = vpop.permute.xlu0 %302 }
 0x237   : > { %v311_v25 = vrot.slane %v303_v24, %v310_v23 }
 0x239   : > { %v313_v26 = vmul.f32 %v311_v25, %v200_v0 }
 0x23b   : > { %314 = vst [vmem:[%s199_s27] sm:$0xff] %v313_v26 }
 0x23c   : > { %569 = shalt.err (!%p566_p10)
}
 0x23d   : > { %s570_s25 = scalar_lea.hbm %s818_s8, 128  ;;  %s574_s26 = scalar_lea.hbm %s865_s3, 256 }
 0x23e   : > { %p571_p1 = scmp.ne.s32.totalorder %s818_s8, %s570_s25  ;;  %p575_p3 = scmp.lt.u32.totalorder %s818_s8, %s865_s3 }
 0x23f   : > { %p576_p11 = scmp.lt.u32.totalorder %s574_s26, %s570_s25  ;;  %p578_p6 = scmp.lt.u32.totalorder %s570_s25, %s818_s8 }
 0x240   : > { %p572_p2 = pnand %p571_p1, %p746_p8 }
 0x241   : > { %p577_p4 = por %p576_p11, %p575_p3 }
 0x242   : > { %p573_p7 = pneg %p572_p2 }
 0x243   : > { %p579_p9 = por %p578_p6, %p577_p4 }
 0x245   : > { %p580_p12 = pnand %p579_p9, %p573_p7 }
 0x247   : > { %583 = shalt.err (!%p580_p12)
}
 0x248   : > { %443 = dma.vmem_to_hbm [thread:$0]  (%p746_p8), %s820_s30, 128, %s818_s8, %s316_s9  }
 0x249 PF: > { %s342_s18 = sand.u32 1, %s614_s12   ;;  %p884_p13 = scmp.ne.s32.totalorder %s870_s19, 0 }
 0x24a   : > { %p885_p0 = scmp.ge.s32.totalorder %s626_s15, 2  ;;  %s343_s20 = scalar_lea.sflag [#allocation4], %s342_s18 }
 0x24c   : > { %p454_p5 = pnand %p885_p0, %p884_p13 }
 0x24e   : > { %609 = dma.done.wait (!%p454_p5), %s343_s20, 128  }
 0x24f   : > { %611 = vsyncadd (!%p454_p5), %s343_s20, 4294967168  ;;  %p17_p10 = scmp.ge.s32.totalorder %s702_s23, 4   ;;  %s886_s12 = smov %s618_s13 }
 0x250   : > { %s887_s13 = smov %s622_s14  ;;  %s888_s14 = smov %s738_s11 }
 0x251   : > { %s889_s15 = smov %s702_s23  ;;  %19 = sbr.rel (!%p17_p10) target bundleno = 6 (0x6), region = 81 }
 0x258   :  { %348 = vsyncpa [#allocation3], 1 }
 0x259   :  { %350 = vsyncpa [#allocation3 + $0x1], 1 }
 0x25a   :  { %351 = vsyncpa [#allocation6], 1 }
 0x25b   :  { %352 = vsyncpa [#allocation4], 1 }
 0x25c   :  { %354 = vsyncpa [#allocation4 + $0x1], 1 }

</bundles_post_ra>
